<compile_context>
chip_gen: v7x
topology: tpu7x:2x2x1
jax: 0.10.0
libtpu: 0.0.40
codegen_flags: <defaults>
</compile_context>

<pallas_src>
import functools

import numpy as np
import jax
import jax.numpy as jnp
from jax.experimental import pallas as pl
from jax.experimental.pallas import tpu as pltpu

INPUT_DIM = 24       # Tennis state dim
OUTPUT_DIM = 2       # Tennis action dim
FC1, FC2, FC3 = 300, 200, 100
BN_EPS = 1e-5

# Padded widths used inside the kernel (lane-dense where it matters).
IN_PAD = 32          # fc1 contraction dim (zero-extended in-kernel)
FC1_P = 384
FC2_P = 256
FC3_P = 128
OUT_P = 8            # padded action width; wrapper slices back to OUTPUT_DIM

# Packed small-parameter slab: rows = [b1, g1, be1, b2, g2, be2, b3, b4],
# each row zero-padded to FC1_P lanes -> shape (8, 384).
P_ROWS = 8
P_WIDTH = FC1_P

MAX_TILE_B = 512     # default batch-tile rows


def _round_up(n, m):
    return ((n + m - 1) // m) * m


def _accumulate_stats(stats_ref, h, mask_row):
    """Accumulate masked column sums / sums-of-squares via the MXU."""
    stats_ref[0:1, :] += jnp.dot(mask_row, h, preferred_element_type=jnp.float32)
    stats_ref[1:2, :] += jnp.dot(mask_row, h * h,
                                 preferred_element_type=jnp.float32)


def _finalize_stats(stats_ref, gamma, beta, inv_n):
    """Turn accumulated (sum, sumsq) rows into fused (scale, shift) rows."""
    mean = stats_ref[0:1, :] * inv_n
    var = jnp.maximum(stats_ref[1:2, :] * inv_n - mean * mean, 0.0)
    scale = jax.lax.rsqrt(var + BN_EPS) * gamma
    stats_ref[0:1, :] = scale
    stats_ref[1:2, :] = beta - mean * scale


def actor_kernel(x_ref, w1_ref, w2_ref, w3_ref, w4_ref, p_ref, out_ref,
                 xpad_ref, stats1_ref, stats2_ref, *, tb, nt, n_valid):
    p = pl.program_id(0)      # phase: 0 = bn1 stats, 1 = bn2 stats, 2 = emit
    i = pl.program_id(1)      # batch tile
    inv_n = 1.0 / n_valid     # TRUE batch size, not tile size

    # One-time scratch init (scratch persists across the whole grid).
    @pl.when(jnp.logical_and(p == 0, i == 0))
    def _():
        xpad_ref[...] = jnp.zeros_like(xpad_ref)
        stats1_ref[...] = jnp.zeros_like(stats1_ref)

    @pl.when(jnp.logical_and(p == 1, i == 0))
    def _():
        stats2_ref[...] = jnp.zeros_like(stats2_ref)

    # Zero-extended input tile: only lanes [0, INPUT_DIM) are live, the rest
    # stay zero from the one-time init above.
    xpad_ref[:, 0:INPUT_DIM] = x_ref[...]

    # Row-validity mask (1.0 for real batch rows, 0.0 for padding rows).
    lane = jax.lax.broadcasted_iota(jnp.int32, (1, tb), 1)
    mask_row = ((i * tb + lane) < n_valid).astype(jnp.float32)      # (1, tb)

    # Small per-layer vectors out of the packed slab (static, free slices).
    b1 = p_ref[0:1, :FC1_P]
    g1 = p_ref[1:2, :FC1_P]
    be1 = p_ref[2:3, :FC1_P]
    b2 = p_ref[3:4, :FC2_P]
    g2 = p_ref[4:5, :FC2_P]
    be2 = p_ref[5:6, :FC2_P]
    b3 = p_ref[6:7, :FC3_P]
    b4 = p_ref[7:8, :OUT_P]

    # fc1 + relu (recomputed every phase; matmuls are tiny, kernel is DMA
    # and per-step-overhead bound, f32 stats stay accurate).
    xb = xpad_ref[...].astype(jnp.bfloat16)
    h1 = jnp.dot(xb, w1_ref[...], preferred_element_type=jnp.float32) + b1
    h1 = jnp.maximum(h1, 0.0)

    @pl.when(p == 0)                       # pass 1: bn1 batch statistics
    def _():
        _accumulate_stats(stats1_ref, h1, mask_row)

        @pl.when(i == nt - 1)
        def _():
            _finalize_stats(stats1_ref, g1, be1, inv_n)

    @pl.when(p > 0)
    def _():
        # bn1 apply (scale/shift fused into two rows of stats1 scratch).
        h1n = h1 * stats1_ref[0:1, :] + stats1_ref[1:2, :]
        h2 = jnp.dot(h1n.astype(jnp.bfloat16), w2_ref[...],
                     preferred_element_type=jnp.float32) + b2
        h2 = jnp.maximum(h2, 0.0)

        @pl.when(p == 1)                   # pass 2: bn2 batch statistics
        def _():
            _accumulate_stats(stats2_ref, h2, mask_row)

            @pl.when(i == nt - 1)
            def _():
                _finalize_stats(stats2_ref, g2, be2, inv_n)

        @pl.when(p == 2)                   # pass 3: bn2 apply + head + write
        def _():
            h2n = h2 * stats2_ref[0:1, :] + stats2_ref[1:2, :]
            h3 = jnp.dot(h2n.astype(jnp.bfloat16), w3_ref[...],
                         preferred_element_type=jnp.float32) + b3
            h3 = jnp.maximum(h3, 0.0)
            h4 = jnp.dot(h3.astype(jnp.bfloat16), w4_ref[...],
                         preferred_element_type=jnp.float32) + b4
            out_ref[...] = jnp.tanh(h4)
        # Note: for p < 2 the output block is written back with don't-care
        # content and fully overwritten during phase 2 (tiny: 32*B bytes).


def actor_forward(state, kparams, *, tile_b=MAX_TILE_B):
    """state: [B, INPUT_DIM] f32 -> actions [B, OUTPUT_DIM] f32 (training-mode BN)."""
    if state.ndim == 1:
        state = state[None, :]
    B = state.shape[0]
    if B < 2:
        # PyTorch BatchNorm1d raises in training mode for B=1 (var undefined).
        raise ValueError("BatchNorm1d training-mode forward requires batch >= 2")
    assert tile_b % 8 == 0

    tb = min(tile_b, _round_up(B, 8))
    b_pad = _round_up(B, tb)
    nt = b_pad // tb

    x = state.astype(jnp.float32)
    if b_pad != B:
        x = jnp.zeros((b_pad, INPUT_DIM), jnp.float32).at[:B].set(x)

    args = (x, kparams["w1"], kparams["w2"], kparams["w3"], kparams["w4"],
            kparams["pslab"])

    kernel = functools.partial(actor_kernel, tb=tb, nt=nt, n_valid=B)

    grid_spec = pltpu.PrefetchScalarGridSpec(
        num_scalar_prefetch=0,
        grid=(3, nt),
        in_specs=[
            pl.BlockSpec((tb, INPUT_DIM), lambda p, i: (i, 0)),     # x tile
            pl.BlockSpec((IN_PAD, FC1_P), lambda p, i: (0, 0)),     # w1 resident
            pl.BlockSpec((FC1_P, FC2_P), lambda p, i: (0, 0)),      # w2 resident
            pl.BlockSpec((FC2_P, FC3_P), lambda p, i: (0, 0)),      # w3 resident
            pl.BlockSpec((FC3_P, OUT_P), lambda p, i: (0, 0)),      # w4 resident
            pl.BlockSpec((P_ROWS, P_WIDTH), lambda p, i: (0, 0)),   # pslab resident
        ],
        out_specs=pl.BlockSpec((tb, OUT_P), lambda p, i: (i, 0)),
        scratch_shapes=[
            pltpu.VMEM((tb, IN_PAD), jnp.float32),    # zero-extended x tile
            pltpu.VMEM((2, FC1_P), jnp.float32),      # bn1 sums -> scale/shift
            pltpu.VMEM((2, FC2_P), jnp.float32),      # bn2 sums -> scale/shift
        ],
    )

    flops = 2 * b_pad * (3 * IN_PAD * FC1_P + 2 * FC1_P * FC2_P
                         + FC2_P * FC3_P + FC3_P * OUT_P
                         + 2 * (FC1_P + FC2_P))
    bytes_accessed = (3 * int(x.size) * 4
                      + sum(int(kparams[k].size) * 2
                            for k in ("w1", "w2", "w3", "w4"))
                      + int(kparams["pslab"].size) * 4
                      + 3 * b_pad * OUT_P * 4)
    cost = pl.CostEstimate(flops=flops,
                           transcendentals=b_pad * OUT_P + 2 * (FC1_P + FC2_P),
                           bytes_accessed=bytes_accessed)

    out = pl.pallas_call(
        kernel,
        out_shape=jax.ShapeDtypeStruct((b_pad, OUT_P), jnp.float32),
        grid_spec=grid_spec,
        compiler_params=pltpu.CompilerParams(
            dimension_semantics=("arbitrary", "arbitrary"),
            vmem_limit_bytes=32 * 1024 * 1024),
        cost_estimate=cost,
    )(*args)
    return out[:B, :OUTPUT_DIM]


def init_params(key):
    """Logical (unpadded) params mirroring the PyTorch reset_parameters ranges."""
    ks = jax.random.split(key, 8)

    def uni(k, shape, lim):
        return jax.random.uniform(k, shape, jnp.float32, minval=-lim, maxval=lim)

    # hidden_init uses weight.size()[0] (== out_features) as "fan_in"; replicate.
    lim1, lim2, lim3 = 1.0 / np.sqrt(FC1), 1.0 / np.sqrt(FC2), 1.0 / np.sqrt(FC3)

    return {
        # weights stored as [in, out] (transposed vs torch's [out, in])
        "w1": uni(ks[0], (INPUT_DIM, FC1), lim1),
        "b1": uni(ks[1], (FC1,), 1.0 / np.sqrt(INPUT_DIM)),
        "w2": uni(ks[2], (FC1, FC2), lim2),
        "b2": uni(ks[3], (FC2,), 1.0 / np.sqrt(FC1)),
        "w3": uni(ks[4], (FC2, FC3), lim3),
        "b3": uni(ks[5], (FC3,), 1.0 / np.sqrt(FC2)),
        "w4": uni(ks[6], (FC3, OUTPUT_DIM), 3e-3),
        "b4": uni(ks[7], (OUTPUT_DIM,), 1.0 / np.sqrt(FC3)),
        # BatchNorm affine params (PyTorch default: gamma=1, beta=0)
        "g1": jnp.ones((FC1,), jnp.float32),
        "be1": jnp.zeros((FC1,), jnp.float32),
        "g2": jnp.ones((FC2,), jnp.float32),
        "be2": jnp.zeros((FC2,), jnp.float32),
    }


def pack_params(p):
    """Zero-pad weights (bf16, MXU-native) and pack small vectors into one slab."""
    def pad2(w, rows, cols):
        out = jnp.zeros((rows, cols), jnp.float32)
        return out.at[: w.shape[0], : w.shape[1]].set(w).astype(jnp.bfloat16)

    def row(v):
        out = jnp.zeros((P_WIDTH,), jnp.float32)
        return out.at[: v.shape[0]].set(v)

    pslab = jnp.stack(
        [row(p["b1"]), row(p["g1"]), row(p["be1"]),
         row(p["b2"]), row(p["g2"]), row(p["be2"]),
         row(p["b3"]), row(p["b4"])], axis=0)          # (8, 384) f32

    return {
        "w1": pad2(p["w1"], IN_PAD, FC1_P),
        "w2": pad2(p["w2"], FC1_P, FC2_P),
        "w3": pad2(p["w3"], FC2_P, FC3_P),
        "w4": pad2(p["w4"], FC3_P, OUT_P),
        "pslab": pslab,
    }


def actor_forward_ref(state, p):
    """Pure-JAX f32 reference (standard two-pass BN) for verification."""
    if state.ndim == 1:
        state = state[None, :]

    def bn(h, g, b):
        mean = jnp.mean(h, axis=0, keepdims=True)
        var = jnp.mean((h - mean) ** 2, axis=0, keepdims=True)
        return (h - mean) * jax.lax.rsqrt(var + BN_EPS) * g + b

    h1 = bn(jnp.maximum(state @ p["w1"] + p["b1"], 0.0), p["g1"], p["be1"])
    h2 = bn(jnp.maximum(h1 @ p["w2"] + p["b2"], 0.0), p["g2"], p["be2"])
    h3 = jnp.maximum(h2 @ p["w3"] + p["b3"], 0.0)
    return jnp.tanh(h3 @ p["w4"] + p["b4"])


if __name__ == "__main__":
    key = jax.random.PRNGKey(0)
    k_param, k_state = jax.random.split(key)

    logical = init_params(k_param)
    kparams = pack_params(logical)

    # Small-batch check (single tile). bf16 matmul operands -> loose tolerance
    # vs the f32 reference; BN stats / rsqrt / tanh stay f32 in the kernel.
    batch = 8
    state = jax.random.normal(k_state, (batch, INPUT_DIM), jnp.float32)
    out = jax.block_until_ready(actor_forward(state, kparams))
    ref = actor_forward_ref(state, logical)
    np.testing.assert_allclose(np.asarray(out), np.asarray(ref),
                               rtol=5e-2, atol=1e-2)
    assert out.shape == (batch, OUTPUT_DIM)
    assert np.all(np.abs(np.asarray(out)) <= 1.0)

    # Multi-tile check: exercises batch tiling, ragged last-tile masking and
    # the three-phase (two-pass BatchNorm) pipeline.
    batch2 = 70
    state2 = jax.random.normal(jax.random.PRNGKey(1), (batch2, INPUT_DIM),
                               jnp.float32)
    out2 = jax.block_until_ready(actor_forward(state2, kparams, tile_b=32))
    ref2 = actor_forward_ref(state2, logical)
    np.testing.assert_allclose(np.asarray(out2), np.asarray(ref2),
                               rtol=5e-2, atol=1e-2)
    assert out2.shape == (batch2, OUTPUT_DIM)

    print("KERNEL_OK")
</pallas_src>

<mosaic_0001>
module attributes {stable_mosaic.version = 11 : i64} {
  func.func @actor_kernel(%arg0: i32, %arg1: i32, %arg2: memref<8x24xf32, #tpu.memory_space<vmem>>, %arg3: memref<32x384xbf16, #tpu.memory_space<vmem>>, %arg4: memref<384x256xbf16, #tpu.memory_space<vmem>>, %arg5: memref<256x128xbf16, #tpu.memory_space<vmem>>, %arg6: memref<128x8xbf16, #tpu.memory_space<vmem>>, %arg7: memref<8x384xf32, #tpu.memory_space<vmem>>, %arg8: memref<8x8xf32, #tpu.memory_space<vmem>>, %arg9: memref<8x32xf32, #tpu.memory_space<vmem>>, %arg10: memref<2x384xf32, #tpu.memory_space<vmem>>, %arg11: memref<2x256xf32, #tpu.memory_space<vmem>>) attributes {dimension_semantics = [#tpu.dimension_semantics<arbitrary>, #tpu.dimension_semantics<arbitrary>], iteration_bounds = array<i64: 3, 1>, scalar_prefetch = 0 : i64, scratch_operands = 3 : i64, tpu.core_type = #tpu.core_type<tc>, window_params = [{transform_indices = @transform_0, window_bounds = array<i64: 8, 24>}, {pipeline_mode = #tpu.pipeline_mode<synchronous>, transform_indices = @transform_1, window_bounds = array<i64: 32, 384>}, {pipeline_mode = #tpu.pipeline_mode<synchronous>, transform_indices = @transform_2, window_bounds = array<i64: 384, 256>}, {pipeline_mode = #tpu.pipeline_mode<synchronous>, transform_indices = @transform_3, window_bounds = array<i64: 256, 128>}, {pipeline_mode = #tpu.pipeline_mode<synchronous>, transform_indices = @transform_4, window_bounds = array<i64: 128, 8>}, {pipeline_mode = #tpu.pipeline_mode<synchronous>, transform_indices = @transform_5, window_bounds = array<i64: 8, 384>}, {transform_indices = @transform_6, window_bounds = array<i64: 8, 8>}]} {
    %c0_i32 = arith.constant 0 : i32
    %0 = arith.cmpi eq, %arg0, %c0_i32 : i32
    %c0_i32_0 = arith.constant 0 : i32
    %1 = arith.cmpi eq, %arg1, %c0_i32_0 : i32
    %2 = arith.andi %0, %1 : i1
    %3 = arith.extui %2 : i1 to i32
    %c0_i32_1 = arith.constant 0 : i32
    %4 = arith.cmpi ne, %3, %c0_i32_1 : i32
    scf.if %4 {
      %cst_26 = arith.constant 0.000000e+00 : f32
      %42 = vector.broadcast %cst_26 : f32 to vector<8x32xf32>
      %c0_27 = arith.constant 0 : index
      %c0_28 = arith.constant 0 : index
      %43 = vector.load %arg9[%c0_27, %c0_28] : memref<8x32xf32, #tpu.memory_space<vmem>>, vector<8x32xf32>
      tpu.vector_store %arg9[%c0_27, %c0_28], %42 {strides = array<i32>} : memref<8x32xf32, #tpu.memory_space<vmem>>, vector<8x32xf32>,
      %cst_29 = arith.constant 0.000000e+00 : f32
      %44 = vector.broadcast %cst_29 : f32 to vector<2x384xf32>
      %c0_30 = arith.constant 0 : index
      %c0_31 = arith.constant 0 : index
      %45 = vector.load %arg10[%c0_30, %c0_31] : memref<2x384xf32, #tpu.memory_space<vmem>>, vector<2x384xf32>
      tpu.vector_store %arg10[%c0_30, %c0_31], %44 {strides = array<i32>} : memref<2x384xf32, #tpu.memory_space<vmem>>, vector<2x384xf32>,
    } else {
    }
    %c1_i32 = arith.constant 1 : i32
    %5 = arith.cmpi eq, %arg0, %c1_i32 : i32
    %c0_i32_2 = arith.constant 0 : i32
    %6 = arith.cmpi eq, %arg1, %c0_i32_2 : i32
    %7 = arith.andi %5, %6 : i1
    %8 = arith.extui %7 : i1 to i32
    %c0_i32_3 = arith.constant 0 : i32
    %9 = arith.cmpi ne, %8, %c0_i32_3 : i32
    scf.if %9 {
      %cst_26 = arith.constant 0.000000e+00 : f32
      %42 = vector.broadcast %cst_26 : f32 to vector<2x256xf32>
      %c0_27 = arith.constant 0 : index
      %c0_28 = arith.constant 0 : index
      %43 = vector.load %arg11[%c0_27, %c0_28] : memref<2x256xf32, #tpu.memory_space<vmem>>, vector<2x256xf32>
      tpu.vector_store %arg11[%c0_27, %c0_28], %42 {strides = array<i32>} : memref<2x256xf32, #tpu.memory_space<vmem>>, vector<2x256xf32>,
    } else {
    }
    %c0 = arith.constant 0 : index
    %c0_4 = arith.constant 0 : index
    %10 = vector.load %arg2[%c0, %c0_4] : memref<8x24xf32, #tpu.memory_space<vmem>>, vector<8x24xf32>
    %c0_5 = arith.constant 0 : index
    %c0_6 = arith.constant 0 : index
    %11 = vector.load %arg9[%c0_5, %c0_6] : memref<8x32xf32, #tpu.memory_space<vmem>>, vector<8x24xf32>
    tpu.vector_store %arg9[%c0_5, %c0_6], %10 {strides = array<i32>} : memref<8x32xf32, #tpu.memory_space<vmem>>, vector<8x24xf32>,
    %12 = tpu.iota {dimensions = array<i32: 1>} : vector<1x8xi32>
    %c8_i32 = arith.constant 8 : i32
    %13 = arith.muli %arg1, %c8_i32 : i32
    %14 = vector.broadcast %13 : i32 to vector<1x8xi32>
    %15 = arith.addi %14, %12 : vector<1x8xi32>
    %c8_i32_7 = arith.constant 8 : i32
    %16 = vector.broadcast %c8_i32_7 : i32 to vector<1x8xi32>
    %17 = arith.cmpi slt, %15, %16 : vector<1x8xi32>
    %18 = arith.extui %17 : vector<1x8xi1> to vector<1x8xi32>
    %19 = arith.sitofp %18 : vector<1x8xi32> to vector<1x8xf32>
    %c0_8 = arith.constant 0 : index
    %c0_9 = arith.constant 0 : index
    %20 = vector.load %arg7[%c0_8, %c0_9] : memref<8x384xf32, #tpu.memory_space<vmem>>, vector<1x384xf32>
    %c1 = arith.constant 1 : index
    %c0_10 = arith.constant 0 : index
    %21 = vector.load %arg7[%c1, %c0_10] : memref<8x384xf32, #tpu.memory_space<vmem>>, vector<1x384xf32>
    %c2 = arith.constant 2 : index
    %c0_11 = arith.constant 0 : index
    %22 = vector.load %arg7[%c2, %c0_11] : memref<8x384xf32, #tpu.memory_space<vmem>>, vector<1x384xf32>
    %c3 = arith.constant 3 : index
    %c0_12 = arith.constant 0 : index
    %23 = vector.load %arg7[%c3, %c0_12] : memref<8x384xf32, #tpu.memory_space<vmem>>, vector<1x256xf32>
    %c4 = arith.constant 4 : index
    %c0_13 = arith.constant 0 : index
    %24 = vector.load %arg7[%c4, %c0_13] : memref<8x384xf32, #tpu.memory_space<vmem>>, vector<1x256xf32>
    %c5 = arith.constant 5 : index
    %c0_14 = arith.constant 0 : index
    %25 = vector.load %arg7[%c5, %c0_14] : memref<8x384xf32, #tpu.memory_space<vmem>>, vector<1x256xf32>
    %c6 = arith.constant 6 : index
    %c0_15 = arith.constant 0 : index
    %26 = vector.load %arg7[%c6, %c0_15] : memref<8x384xf32, #tpu.memory_space<vmem>>, vector<1x128xf32>
    %c7 = arith.constant 7 : index
    %c0_16 = arith.constant 0 : index
    %27 = vector.load %arg7[%c7, %c0_16] : memref<8x384xf32, #tpu.memory_space<vmem>>, vector<1x8xf32>
    %c0_17 = arith.constant 0 : index
    %c0_18 = arith.constant 0 : index
    %28 = vector.load %arg9[%c0_17, %c0_18] : memref<8x32xf32, #tpu.memory_space<vmem>>, vector<8x32xf32>
    %29 = arith.truncf %28 : vector<8x32xf32> to vector<8x32xbf16>
    %c0_19 = arith.constant 0 : index
    %c0_20 = arith.constant 0 : index
    %30 = vector.load %arg3[%c0_19, %c0_20] : memref<32x384xbf16, #tpu.memory_space<vmem>>, vector<32x384xbf16>
    %cst = arith.constant dense<0.000000e+00> : vector<8x384xf32>
    %31 = tpu.matmul %29, %30, %cst {dimension_numbers = #tpu.dot_dimension_numbers<[1], [0], [0], [1], [0, 0, 1, 1], [], []>} : vector<8x32xbf16>, vector<32x384xbf16>, vector<8x384xf32> -> vector<8x384xf32>
    %32 = vector.broadcast %20 : vector<1x384xf32> to vector<8x384xf32>
    %33 = arith.addf %31, %32 : vector<8x384xf32>
    %cst_21 = arith.constant 0.000000e+00 : f32
    %34 = vector.broadcast %cst_21 : f32 to vector<8x384xf32>
    %35 = arith.maximumf %33, %34 : vector<8x384xf32>
    %c0_i32_22 = arith.constant 0 : i32
    %36 = arith.cmpi eq, %arg0, %c0_i32_22 : i32
    %37 = arith.extui %36 : i1 to i32
    %c0_i32_23 = arith.constant 0 : i32
    %38 = arith.cmpi ne, %37, %c0_i32_23 : i32
    scf.if %38 {
      %c0_26 = arith.constant 0 : index
      %c0_27 = arith.constant 0 : index
      %42 = vector.load %arg10[%c0_26, %c0_27] : memref<2x384xf32, #tpu.memory_space<vmem>>, vector<1x384xf32>
      %cst_28 = arith.constant dense<0.000000e+00> : vector<1x384xf32>
      %43 = tpu.matmul %19, %35, %cst_28 {dimension_numbers = #tpu.dot_dimension_numbers<[1], [0], [0], [1], [0, 0, 1, 1], [], []>} : vector<1x8xf32>, vector<8x384xf32>, vector<1x384xf32> -> vector<1x384xf32>
      %44 = arith.addf %42, %43 : vector<1x384xf32>
      %c0_29 = arith.constant 0 : index
      %c0_30 = arith.constant 0 : index
      %45 = vector.load %arg10[%c0_29, %c0_30] : memref<2x384xf32, #tpu.memory_space<vmem>>, vector<1x384xf32>
      tpu.vector_store %arg10[%c0_29, %c0_30], %44 {strides = array<i32>} : memref<2x384xf32, #tpu.memory_space<vmem>>, vector<1x384xf32>,
      %c1_31 = arith.constant 1 : index
      %c0_32 = arith.constant 0 : index
      %46 = vector.load %arg10[%c1_31, %c0_32] : memref<2x384xf32, #tpu.memory_space<vmem>>, vector<1x384xf32>
      %47 = arith.mulf %35, %35 : vector<8x384xf32>
      %cst_33 = arith.constant dense<0.000000e+00> : vector<1x384xf32>
      %48 = tpu.matmul %19, %47, %cst_33 {dimension_numbers = #tpu.dot_dimension_numbers<[1], [0], [0], [1], [0, 0, 1, 1], [], []>} : vector<1x8xf32>, vector<8x384xf32>, vector<1x384xf32> -> vector<1x384xf32>
      %49 = arith.addf %46, %48 : vector<1x384xf32>
      %c1_34 = arith.constant 1 : index
      %c0_35 = arith.constant 0 : index
      %50 = vector.load %arg10[%c1_34, %c0_35] : memref<2x384xf32, #tpu.memory_space<vmem>>, vector<1x384xf32>
      tpu.vector_store %arg10[%c1_34, %c0_35], %49 {strides = array<i32>} : memref<2x384xf32, #tpu.memory_space<vmem>>, vector<1x384xf32>,
      %c0_i32_36 = arith.constant 0 : i32
      %51 = arith.cmpi eq, %arg1, %c0_i32_36 : i32
      %52 = arith.extui %51 : i1 to i32
      %c0_i32_37 = arith.constant 0 : i32
      %53 = arith.cmpi ne, %52, %c0_i32_37 : i32
      scf.if %53 {
        %c0_38 = arith.constant 0 : index
        %c0_39 = arith.constant 0 : index
        %54 = vector.load %arg10[%c0_38, %c0_39] : memref<2x384xf32, #tpu.memory_space<vmem>>, vector<1x384xf32>
        %cst_40 = arith.constant 1.250000e-01 : f32
        %55 = vector.broadcast %cst_40 : f32 to vector<1x384xf32>
        %56 = arith.mulf %54, %55 : vector<1x384xf32>
        %c1_41 = arith.constant 1 : index
        %c0_42 = arith.constant 0 : index
        %57 = vector.load %arg10[%c1_41, %c0_42] : memref<2x384xf32, #tpu.memory_space<vmem>>, vector<1x384xf32>
        %cst_43 = arith.constant 1.250000e-01 : f32
        %58 = vector.broadcast %cst_43 : f32 to vector<1x384xf32>
        %59 = arith.mulf %57, %58 : vector<1x384xf32>
        %60 = arith.mulf %56, %56 : vector<1x384xf32>
        %61 = arith.subf %59, %60 : vector<1x384xf32>
        %cst_44 = arith.constant 0.000000e+00 : f32
        %62 = vector.broadcast %cst_44 : f32 to vector<1x384xf32>
        %63 = arith.maximumf %61, %62 : vector<1x384xf32>
        %cst_45 = arith.constant 9.99999974E-6 : f32
        %64 = vector.broadcast %cst_45 : f32 to vector<1x384xf32>
        %65 = arith.addf %63, %64 : vector<1x384xf32>
        %66 = math.rsqrt %65 : vector<1x384xf32>
        %67 = arith.mulf %66, %21 : vector<1x384xf32>
        %c0_46 = arith.constant 0 : index
        %c0_47 = arith.constant 0 : index
        %68 = vector.load %arg10[%c0_46, %c0_47] : memref<2x384xf32, #tpu.memory_space<vmem>>, vector<1x384xf32>
        tpu.vector_store %arg10[%c0_46, %c0_47], %67 {strides = array<i32>} : memref<2x384xf32, #tpu.memory_space<vmem>>, vector<1x384xf32>,
        %69 = arith.mulf %56, %67 : vector<1x384xf32>
        %70 = arith.subf %22, %69 : vector<1x384xf32>
        %c1_48 = arith.constant 1 : index
        %c0_49 = arith.constant 0 : index
        %71 = vector.load %arg10[%c1_48, %c0_49] : memref<2x384xf32, #tpu.memory_space<vmem>>, vector<1x384xf32>
        tpu.vector_store %arg10[%c1_48, %c0_49], %70 {strides = array<i32>} : memref<2x384xf32, #tpu.memory_space<vmem>>, vector<1x384xf32>,
      } else {
      }
    } else {
    }
    %c0_i32_24 = arith.constant 0 : i32
    %39 = arith.cmpi sgt, %arg0, %c0_i32_24 : i32
    %40 = arith.extui %39 : i1 to i32
    %c0_i32_25 = arith.constant 0 : i32
    %41 = arith.cmpi ne, %40, %c0_i32_25 : i32
    scf.if %41 {
      %c0_26 = arith.constant 0 : index
      %c0_27 = arith.constant 0 : index
      %42 = vector.load %arg10[%c0_26, %c0_27] : memref<2x384xf32, #tpu.memory_space<vmem>>, vector<1x384xf32>
      %43 = vector.broadcast %42 : vector<1x384xf32> to vector<8x384xf32>
      %44 = arith.mulf %35, %43 : vector<8x384xf32>
      %c1_28 = arith.constant 1 : index
      %c0_29 = arith.constant 0 : index
      %45 = vector.load %arg10[%c1_28, %c0_29] : memref<2x384xf32, #tpu.memory_space<vmem>>, vector<1x384xf32>
      %46 = vector.broadcast %45 : vector<1x384xf32> to vector<8x384xf32>
      %47 = arith.addf %44, %46 : vector<8x384xf32>
      %48 = arith.truncf %47 : vector<8x384xf32> to vector<8x384xbf16>
      %c0_30 = arith.constant 0 : index
      %c0_31 = arith.constant 0 : index
      %49 = vector.load %arg4[%c0_30, %c0_31] : memref<384x256xbf16, #tpu.memory_space<vmem>>, vector<384x256xbf16>
      %cst_32 = arith.constant dense<0.000000e+00> : vector<8x256xf32>
      %50 = tpu.matmul %48, %49, %cst_32 {dimension_numbers = #tpu.dot_dimension_numbers<[1], [0], [0], [1], [0, 0, 1, 1], [], []>} : vector<8x384xbf16>, vector<384x256xbf16>, vector<8x256xf32> -> vector<8x256xf32>
      %51 = vector.broadcast %23 : vector<1x256xf32> to vector<8x256xf32>
      %52 = arith.addf %50, %51 : vector<8x256xf32>
      %cst_33 = arith.constant 0.000000e+00 : f32
      %53 = vector.broadcast %cst_33 : f32 to vector<8x256xf32>
      %54 = arith.maximumf %52, %53 : vector<8x256xf32>
      %c1_i32_34 = arith.constant 1 : i32
      %55 = arith.cmpi eq, %arg0, %c1_i32_34 : i32
      %56 = arith.extui %55 : i1 to i32
      %c0_i32_35 = arith.constant 0 : i32
      %57 = arith.cmpi ne, %56, %c0_i32_35 : i32
      scf.if %57 {
        %c0_37 = arith.constant 0 : index
        %c0_38 = arith.constant 0 : index
        %61 = vector.load %arg11[%c0_37, %c0_38] : memref<2x256xf32, #tpu.memory_space<vmem>>, vector<1x256xf32>
        %cst_39 = arith.constant dense<0.000000e+00> : vector<1x256xf32>
        %62 = tpu.matmul %19, %54, %cst_39 {dimension_numbers = #tpu.dot_dimension_numbers<[1], [0], [0], [1], [0, 0, 1, 1], [], []>} : vector<1x8xf32>, vector<8x256xf32>, vector<1x256xf32> -> vector<1x256xf32>
        %63 = arith.addf %61, %62 : vector<1x256xf32>
        %c0_40 = arith.constant 0 : index
        %c0_41 = arith.constant 0 : index
        %64 = vector.load %arg11[%c0_40, %c0_41] : memref<2x256xf32, #tpu.memory_space<vmem>>, vector<1x256xf32>
        tpu.vector_store %arg11[%c0_40, %c0_41], %63 {strides = array<i32>} : memref<2x256xf32, #tpu.memory_space<vmem>>, vector<1x256xf32>,
        %c1_42 = arith.constant 1 : index
        %c0_43 = arith.constant 0 : index
        %65 = vector.load %arg11[%c1_42, %c0_43] : memref<2x256xf32, #tpu.memory_space<vmem>>, vector<1x256xf32>
        %66 = arith.mulf %54, %54 : vector<8x256xf32>
        %cst_44 = arith.constant dense<0.000000e+00> : vector<1x256xf32>
        %67 = tpu.matmul %19, %66, %cst_44 {dimension_numbers = #tpu.dot_dimension_numbers<[1], [0], [0], [1], [0, 0, 1, 1], [], []>} : vector<1x8xf32>, vector<8x256xf32>, vector<1x256xf32> -> vector<1x256xf32>
        %68 = arith.addf %65, %67 : vector<1x256xf32>
        %c1_45 = arith.constant 1 : index
        %c0_46 = arith.constant 0 : index
        %69 = vector.load %arg11[%c1_45, %c0_46] : memref<2x256xf32, #tpu.memory_space<vmem>>, vector<1x256xf32>
        tpu.vector_store %arg11[%c1_45, %c0_46], %68 {strides = array<i32>} : memref<2x256xf32, #tpu.memory_space<vmem>>, vector<1x256xf32>,
        %c0_i32_47 = arith.constant 0 : i32
        %70 = arith.cmpi eq, %arg1, %c0_i32_47 : i32
        %71 = arith.extui %70 : i1 to i32
        %c0_i32_48 = arith.constant 0 : i32
        %72 = arith.cmpi ne, %71, %c0_i32_48 : i32
        scf.if %72 {
          %c0_49 = arith.constant 0 : index
          %c0_50 = arith.constant 0 : index
          %73 = vector.load %arg11[%c0_49, %c0_50] : memref<2x256xf32, #tpu.memory_space<vmem>>, vector<1x256xf32>
          %cst_51 = arith.constant 1.250000e-01 : f32
          %74 = vector.broadcast %cst_51 : f32 to vector<1x256xf32>
          %75 = arith.mulf %73, %74 : vector<1x256xf32>
          %c1_52 = arith.constant 1 : index
          %c0_53 = arith.constant 0 : index
          %76 = vector.load %arg11[%c1_52, %c0_53] : memref<2x256xf32, #tpu.memory_space<vmem>>, vector<1x256xf32>
          %cst_54 = arith.constant 1.250000e-01 : f32
          %77 = vector.broadcast %cst_54 : f32 to vector<1x256xf32>
          %78 = arith.mulf %76, %77 : vector<1x256xf32>
          %79 = arith.mulf %75, %75 : vector<1x256xf32>
          %80 = arith.subf %78, %79 : vector<1x256xf32>
          %cst_55 = arith.constant 0.000000e+00 : f32
          %81 = vector.broadcast %cst_55 : f32 to vector<1x256xf32>
          %82 = arith.maximumf %80, %81 : vector<1x256xf32>
          %cst_56 = arith.constant 9.99999974E-6 : f32
          %83 = vector.broadcast %cst_56 : f32 to vector<1x256xf32>
          %84 = arith.addf %82, %83 : vector<1x256xf32>
          %85 = math.rsqrt %84 : vector<1x256xf32>
          %86 = arith.mulf %85, %24 : vector<1x256xf32>
          %c0_57 = arith.constant 0 : index
          %c0_58 = arith.constant 0 : index
          %87 = vector.load %arg11[%c0_57, %c0_58] : memref<2x256xf32, #tpu.memory_space<vmem>>, vector<1x256xf32>
          tpu.vector_store %arg11[%c0_57, %c0_58], %86 {strides = array<i32>} : memref<2x256xf32, #tpu.memory_space<vmem>>, vector<1x256xf32>,
          %88 = arith.mulf %75, %86 : vector<1x256xf32>
          %89 = arith.subf %25, %88 : vector<1x256xf32>
          %c1_59 = arith.constant 1 : index
          %c0_60 = arith.constant 0 : index
          %90 = vector.load %arg11[%c1_59, %c0_60] : memref<2x256xf32, #tpu.memory_space<vmem>>, vector<1x256xf32>
          tpu.vector_store %arg11[%c1_59, %c0_60], %89 {strides = array<i32>} : memref<2x256xf32, #tpu.memory_space<vmem>>, vector<1x256xf32>,
        } else {
        }
      } else {
      }
      %c2_i32 = arith.constant 2 : i32
      %58 = arith.cmpi eq, %arg0, %c2_i32 : i32
      %59 = arith.extui %58 : i1 to i32
      %c0_i32_36 = arith.constant 0 : i32
      %60 = arith.cmpi ne, %59, %c0_i32_36 : i32
      scf.if %60 {
        %c0_37 = arith.constant 0 : index
        %c0_38 = arith.constant 0 : index
        %61 = vector.load %arg11[%c0_37, %c0_38] : memref<2x256xf32, #tpu.memory_space<vmem>>, vector<1x256xf32>
        %62 = vector.broadcast %61 : vector<1x256xf32> to vector<8x256xf32>
        %63 = arith.mulf %54, %62 : vector<8x256xf32>
        %c1_39 = arith.constant 1 : index
        %c0_40 = arith.constant 0 : index
        %64 = vector.load %arg11[%c1_39, %c0_40] : memref<2x256xf32, #tpu.memory_space<vmem>>, vector<1x256xf32>
        %65 = vector.broadcast %64 : vector<1x256xf32> to vector<8x256xf32>
        %66 = arith.addf %63, %65 : vector<8x256xf32>
        %67 = arith.truncf %66 : vector<8x256xf32> to vector<8x256xbf16>
        %c0_41 = arith.constant 0 : index
        %c0_42 = arith.constant 0 : index
        %68 = vector.load %arg5[%c0_41, %c0_42] : memref<256x128xbf16, #tpu.memory_space<vmem>>, vector<256x128xbf16>
        %cst_43 = arith.constant dense<0.000000e+00> : vector<8x128xf32>
        %69 = tpu.matmul %67, %68, %cst_43 {dimension_numbers = #tpu.dot_dimension_numbers<[1], [0], [0], [1], [0, 0, 1, 1], [], []>} : vector<8x256xbf16>, vector<256x128xbf16>, vector<8x128xf32> -> vector<8x128xf32>
        %70 = vector.broadcast %26 : vector<1x128xf32> to vector<8x128xf32>
        %71 = arith.addf %69, %70 : vector<8x128xf32>
        %cst_44 = arith.constant 0.000000e+00 : f32
        %72 = vector.broadcast %cst_44 : f32 to vector<8x128xf32>
        %73 = arith.maximumf %71, %72 : vector<8x128xf32>
        %74 = arith.truncf %73 : vector<8x128xf32> to vector<8x128xbf16>
        %c0_45 = arith.constant 0 : index
        %c0_46 = arith.constant 0 : index
        %75 = vector.load %arg6[%c0_45, %c0_46] : memref<128x8xbf16, #tpu.memory_space<vmem>>, vector<128x8xbf16>
        %cst_47 = arith.constant dense<0.000000e+00> : vector<8x8xf32>
        %76 = tpu.matmul %74, %75, %cst_47 {dimension_numbers = #tpu.dot_dimension_numbers<[1], [0], [0], [1], [0, 0, 1, 1], [], []>} : vector<8x128xbf16>, vector<128x8xbf16>, vector<8x8xf32> -> vector<8x8xf32>
        %77 = vector.broadcast %27 : vector<1x8xf32> to vector<8x8xf32>
        %78 = arith.addf %76, %77 : vector<8x8xf32>
        %79 = math.tanh %78 : vector<8x8xf32>
        %c0_48 = arith.constant 0 : index
        %c0_49 = arith.constant 0 : index
        %80 = vector.load %arg8[%c0_48, %c0_49] : memref<8x8xf32, #tpu.memory_space<vmem>>, vector<8x8xf32>
        tpu.vector_store %arg8[%c0_48, %c0_49], %79 {strides = array<i32>} : memref<8x8xf32, #tpu.memory_space<vmem>>, vector<8x8xf32>,
      } else {
      }
    } else {
    }
    return
  }
  func.func @transform_0(%arg0: i32, %arg1: i32) -> (i32, i32) {
    %c0_i32 = arith.constant 0 : i32
    %c0_i32_0 = arith.constant 0 : i32
    return %arg1, %c0_i32 : i32, i32
  }
  func.func @transform_1(%arg0: i32, %arg1: i32) -> (i32, i32) {
    %c0_i32 = arith.constant 0 : i32
    %c0_i32_0 = arith.constant 0 : i32
    %c0_i32_1 = arith.constant 0 : i32
    return %c0_i32, %c0_i32_0 : i32, i32
  }
  func.func @transform_2(%arg0: i32, %arg1: i32) -> (i32, i32) {
    %c0_i32 = arith.constant 0 : i32
    %c0_i32_0 = arith.constant 0 : i32
    %c0_i32_1 = arith.constant 0 : i32
    return %c0_i32, %c0_i32_0 : i32, i32
  }
  func.func @transform_3(%arg0: i32, %arg1: i32) -> (i32, i32) {
    %c0_i32 = arith.constant 0 : i32
    %c0_i32_0 = arith.constant 0 : i32
    %c0_i32_1 = arith.constant 0 : i32
    return %c0_i32, %c0_i32_0 : i32, i32
  }
  func.func @transform_4(%arg0: i32, %arg1: i32) -> (i32, i32) {
    %c0_i32 = arith.constant 0 : i32
    %c0_i32_0 = arith.constant 0 : i32
    %c0_i32_1 = arith.constant 0 : i32
    return %c0_i32, %c0_i32_0 : i32, i32
  }
  func.func @transform_5(%arg0: i32, %arg1: i32) -> (i32, i32) {
    %c0_i32 = arith.constant 0 : i32
    %c0_i32_0 = arith.constant 0 : i32
    %c0_i32_1 = arith.constant 0 : i32
    return %c0_i32, %c0_i32_0 : i32, i32
  }
  func.func @transform_6(%arg0: i32, %arg1: i32) -> (i32, i32) {
    %c0_i32 = arith.constant 0 : i32
    %c0_i32_0 = arith.constant 0 : i32
    return %arg1, %c0_i32 : i32, i32
  }
}

</mosaic_0001>

<bundles_post_ra>
// kernel: tpu_custom_call.1
= control target key start
LH: loop header
LB: loop body
LE: loop exit
PB: predicated region body
PF: predicated region fallthrough
CT: control target
= control target key end

     0   :  { %11 = vsyncpa [#allocation6], 0  ;;  %s2826_s0 = inlined_call_operand.hbm [shape: f32[8,24], index: 0, kind: input, shape index: {}]   ;;  %s2827_s1 = inlined_call_operand.vmem [shape: bf16[32,384], index: 1, kind: input, shape index: {}]   ;;  %s2828_s2 = inlined_call_operand.hbm [shape: bf16[384,256], index: 2, kind: input, shape index: {}]   ;;  %s2829_s3 = inlined_call_operand.hbm [shape: bf16[256,128], index: 3, kind: input, shape index: {}]   ;;  %s2830_s4 = inlined_call_operand.vmem [shape: bf16[128,8], index: 4, kind: input, shape index: {}]   ;;  %s2831_s5 = inlined_call_operand.vmem [shape: f32[8,384], index: 5, kind: input, shape index: {}]   ;;  %s2832_s6 = inlined_call_operand.hbm [shape: f32[8,8], index: 6, kind: output, shape index: {}]  }
   0x1   :  { %12 = vsyncpa [#allocation9], 0 }
   0x2   :  { %13 = vsyncpa [#allocation7], 0  ;;  %s2466_s21 = smov 0   ;;  %s2468_s22 = smov 0  }
   0x3   :  { %s2470_s23 = smov 0  }
   0x4 LB: > { %s2410_s24 = smov [#allocation8]   ;;  %s1882_s26 = sadd.s32 4294967295, %s2408_s23   ;;  %s2408_s23 = sphi %s2470_s23, %s19_s23   ;;  %s2404_s22 = sphi %s2468_s22, %s2849_s22   ;;  %s2400_s21 = sphi %s2466_s21, %s2848_s21  }
   0x5   : > { %s221_s25 = sshll.u32 %s2410_s24, 4  ;;  %p1883_p0 = scmp.ge.s32.totalorder %s2408_s23, 1  ;;  %s2490_s25 = int_to_ptr.vmem [resolvable:$true] %s221_s25 }
   0x6   : > { %p193_p1 = scmp.lt.s32.totalorder %s2408_s23, 4  ;;  %p2486_p2 = scmp.eq.s32.totalorder %s1882_s26, 0 }
   0x7   : > { %s31_s30 = sadd.s32 1, %s2404_s22  ;;  %s2411_s8 = smov [#allocation5]  }
   0x8   : > { %s2836_s27 = scalar_select %p2486_p2, 1, 0 }
   0x9   : > { %p2492_p3 = pnand %p1883_p0, %p193_p1  ;;  %p2505_p6 = scmp.ge.s32.totalorder %s31_s30, 3 }
   0xa   : > { %s208_s9 = sshll.u32 %s2411_s8, 4  ;;  %s2264_s12 = scalar_lea.hbm %s2828_s2, 6144  ;;  %s209_s9 = int_to_ptr.vmem [resolvable:$true] %s208_s9 }
   0xb   : > { %s2837_s28 = scalar_select %p2492_p3, 1, 0 }
   0xc   : > { %p2091_p4 = pneg %p2492_p3  ;;  %p2265_p7 = scmp.ne.s32.totalorder %s2828_s2, %s2264_s12 }
   0xd   : > { %p2271_p11 = scmp.lt.u32.totalorder %s2264_s12, %s2828_s2 }
   0xe   : > { %p2500_p5 = pnand %p2486_p2, %p2091_p4 }
  0x10   : > { %p2517_p8 = pneg %p2500_p5 }
  0x12   : > { %p2267_p9 = pnand %p2517_p8, %p2265_p7 }
  0x14   : > { %p2268_p10 = pneg %p2267_p9 }
  0x16   : > { %p2273_p12 = pnand %p2271_p11, %p2268_p10 }
  0x18   : > { %2276 = shalt.err (!%p2273_p12)
}
  0x19   : > { %s2277_s18 = scalar_lea.vmem %s2490_s25, 6144  ;;  %p2285_p4 = scmp.lt.s32.totalorder %s2490_s25, %s2490_s25 }
  0x1a   : > { %p2278_p13 = scmp.ne.s32.totalorder %s2490_s25, %s2277_s18  ;;  %p2286_p2 = scmp.lt.s32.totalorder %s2277_s18, %s2277_s18 }
  0x1c   : > { %p2280_p0 = pnand %p2278_p13, %p2517_p8  ;;  %p2287_p7 = por %p2286_p2, %p2285_p4 }
  0x1e   : > { %p2281_p1 = pneg %p2280_p0 }
  0x20   : > { %p2288_p9 = pnand %p2287_p7, %p2281_p1 }
  0x22   : > { %2291 = shalt.err (!%p2288_p9)
}
  0x23   : > { %s2412_s19 = smov 128   ;;  %s2413_s20 = smov 8  }
  0x24   : > { %2097 = dma.hbm_to_vmem [thread:$0]  (!%p2500_p5), %s2828_s2, 6144, %s2490_s25, [#allocation9], %s2412_s19, %s2412_s19, %s2413_s20  }
  0x25   : > { %s2851_s30 = smov (%p2505_p6, %s31_s30), 0  ;;  %s2292_s12 = scalar_lea.hbm %s2826_s0, 128 }
  0x26   : > { %p2293_p2 = scmp.ne.s32.totalorder %s2826_s0, %s2292_s12  ;;  %p2299_p12 = scmp.lt.u32.totalorder %s2292_s12, %s2826_s0 }
  0x28   : > { %p2295_p10 = pnand %p2293_p2, %p2517_p8 }
  0x2a   : > { %p2296_p11 = pneg %p2295_p10 }
  0x2c   : > { %p2301_p13 = pnand %p2299_p12, %p2296_p11 }
  0x2e   : > { %2304 = shalt.err (!%p2301_p13)
}
  0x2f   : > { %s2305_s25 = scalar_lea.vmem %s209_s9, 128  ;;  %p2313_p4 = scmp.lt.s32.totalorder %s209_s9, %s209_s9 }
  0x30   : > { %p2306_p6 = scmp.ne.s32.totalorder %s209_s9, %s2305_s25  ;;  %p2314_p7 = scmp.lt.s32.totalorder %s2305_s25, %s2305_s25 }
  0x32   : > { %p2308_p0 = pnand %p2306_p6, %p2517_p8  ;;  %p2315_p9 = por %p2314_p7, %p2313_p4 }
  0x34   : > { %p2309_p1 = pneg %p2308_p0 }
  0x36   : > { %p2316_p3 = pnand %p2315_p9, %p2309_p1 }
  0x38   : > { %2319 = shalt.err (!%p2316_p3)
}
  0x39   : > { %2094 = dma.hbm_to_vmem [thread:$0]  (!%p2500_p5), %s2826_s0, 128, %s209_s9, [#allocation6]  }
  0x3a   : > { %s2414_s19 = smov [#allocation10]   ;;  %s2320_s10 = scalar_lea.hbm %s2829_s3, 2048 }
  0x3b   : > { %s234_s20 = sshll.u32 %s2414_s19, 4  ;;  %p2321_p2 = scmp.ne.s32.totalorder %s2829_s3, %s2320_s10  ;;  %s235_s20 = int_to_ptr.vmem [resolvable:$true] %s234_s20 }
  0x3c   : > { %p2327_p11 = scmp.lt.u32.totalorder %s2320_s10, %s2829_s3 }
  0x3d   : > { %p2323_p3 = pnand %p2321_p2, %p2517_p8 }
  0x3f   : > { %p2324_p10 = pneg %p2323_p3 }
  0x41   : > { %p2329_p12 = pnand %p2327_p11, %p2324_p10 }
  0x43   : > { %2332 = shalt.err (!%p2329_p12)
}
  0x44   : > { %s2333_s9 = scalar_lea.vmem %s235_s20, 2048  ;;  %p2341_p1 = scmp.lt.s32.totalorder %s235_s20, %s235_s20 }
  0x45   : > { %p2334_p13 = scmp.ne.s32.totalorder %s235_s20, %s2333_s9  ;;  %p2342_p4 = scmp.lt.s32.totalorder %s2333_s9, %s2333_s9 }
  0x47   : > { %p2336_p6 = pnand %p2334_p13, %p2517_p8  ;;  %p2343_p7 = por %p2342_p4, %p2341_p1 }
  0x49   : > { %p2337_p0 = pneg %p2336_p6 }
  0x4b   : > { %p2344_p9 = pnand %p2343_p7, %p2337_p0 }
  0x4d   : > { %2347 = shalt.err (!%p2344_p9)
}
  0x4e   : > { %s2415_s16 = smov 64   ;;  %s2416_s17 = smov 4  }
  0x4f   : > { %2100 = dma.hbm_to_vmem [thread:$0]  (!%p2500_p5), %s2829_s3, 2048, %s235_s20, [#allocation9], %s2415_s16, %s2415_s16, %s2416_s17  }
  0x50   : > { %p2841_p2 = scmp.ne.s32.totalorder %s2837_s28, 0 }
  0x51   : > { %p2842_p3 = scmp.ne.s32.totalorder (!%p2841_p2), %s2836_s27, 0 }
  0x52   : > { %256 = sbr.rel (%p2841_p2) target bundleno = 1657 (0x679), region = 44 }
  0x59   : > { %2387 = dma.done.wait (%p2842_p3), [#allocation6], 128  }
  0x5a   : > { %2389 = vsyncadd (%p2842_p3), [#allocation6], 4294967168 }
  0x5b   : > { %2391 = dma.done.wait (%p2842_p3), [#allocation9], 8192  }
  0x5c   : > { %2393 = vsyncadd (%p2842_p3), [#allocation9], 4294959104  ;;  %p285_p8 = scmp.eq.s32.totalorder %s2400_s21, 0 }
  0x5d   : > { %vm291_vm0 = vcmask (%p285_p8), 261120   ;;  %v2417_v0 = vmov (%p285_p8), 0.0  }
  0x5e   : > { %290 = sbr.rel (!%p285_p8) target bundleno = 101 (0x65), region = 60  ;;  %292 = vst.msk [vmem:[#allocation2] sm:$0xff] (%p285_p8), %vm291_vm0, %v2417_v0  ;;  %293 = vst [vmem:[#allocation3] sm:$0x3f] (%p285_p8), %v2417_v0 }
  0x65 PF: > { %p294_p5 = scmp.eq.s32.totalorder %s2400_s21, 1 }
  0x66   : > { %v2418_v1 = vmov (%p294_p5), 0.0  }
  0x67   : > { %298 = sbr.rel (!%p294_p5) target bundleno = 110 (0x6e), region = 64  ;;  %299 = vst [vmem:[#allocation4] sm:$0xf] (%p294_p5), %v2418_v1 }
  0x6e PF: > { %v2593_v2 = vld [vmem:[%s2831_s5 + $0x1] ss:$8 sm:$0x7]  ;;  %v2598_v3 = vld [vmem:[%s2831_s5 + $0x2] ss:$8 sm:$0x7]  ;;  %v303_v6 = vlaneseq }
  0x6f   : > { %v2603_v4 = vld [vmem:[%s2831_s5 + $0x3] ss:$8 sm:$0x3]  ;;  %v2608_v5 = vld [vmem:[%s2831_s5 + $0x4] ss:$8 sm:$0x3] }
  0x70   : > { %v2613_v7 = vld [vmem:[%s2831_s5 + $0x5] ss:$8 sm:$0x3]  ;;  %v2618_v8 = vld [vmem:[%s2831_s5 + $0x6] ss:$0 sm:$0xff]  ;;  %v304_v11 = vand.u32 127, %v303_v6 }
  0x71   : > { %v2623_v9 = vld [vmem:[%s2831_s5 + $0x7] ss:$0 sm:$0xff]  ;;  %v2156_v12 = vld [vmem:[%s2827_s1] ss:$12 sps:$4 sm:$0xff]   ;;  %v2419_v13 = vmov 0.0   ;;  %v2420_v19 = vmov 0  }
  0x72   : > { %v2154_v10 = vld [vmem:[%s2827_s1 + $0x4] ss:$12 sps:$4 sm:$0xff]   ;;  %vm308_vm1 = vcmp.lt.s32.totalorder %v304_v11, 8  ;;  %2033 = vmatprep.subr.bf16.mxu1 %v2419_v13  ;;  %v2157_v14 = vld [vmem:[%s2827_s1 + $0x8] ss:$12 sps:$4 sm:$0xff]   ;;  %418 = vmatprep.mubr.bf16.mxu0 %v2420_v19  ;;  %vm301_vm2 = vcmask 195584  }
  0x73   : > { %386 = vmatprep.subr.bf16.mxu0 %v2154_v10  ;;  %v2635_v15 = vsel %vm308_vm1, 1.0, %v2419_v13  ;;  %v2158_v16 = vld [vmem:[%s2827_s1 + $0x1c] ss:$12 sps:$4 sm:$0xff]   ;;  %v2160_v17 = vld [vmem:[%s2827_s1 + $0x18] ss:$12 sps:$4 sm:$0xff]   ;;  %2034 = vmatpush3.bf16.msra.mxu1 %v2157_v14  ;;  %vm2421_vm3 = vmmov 0  }
  0x74   : > { %387 = vmatpush1.bf16.msra.mxu0 %v2156_v12  ;;  %v2161_v18 = vld [vmem:[%s2827_s1 + $0x20] ss:$12 sps:$4 sm:$0xff]   ;;  %2035 = vmatprep.subr.bf16.mxu1 %v2419_v13  ;;  %v300_v20 = vld [vmem:[#allocation5] sm:$0xff]  ;;  %vm382_vm4 = vcmask 261120   ;;  %v2647_v23 = vshrl.u32 %v303_v6, 7  ;;  %p1907_p10 = scmp.ne.s32.totalorder %s2400_s21, 0 }
  0x75   : > { %388 = vmatprep.subr.bf16.mxu0 %v2158_v16  ;;  %2037 = vmatprep.mubr.msk.bf16.mxu1 %vm2421_vm3, %v2419_v13  ;;  %302 = vst.msk [vmem:[#allocation2] sm:$0xff] %vm301_vm2, %v300_v20  ;;  %v311_v26 = vld [vmem:[%s2831_s5] ss:$8 sm:$0x7]  ;;  %vm474_vm5 = vcmask (!%p1907_p10), 64512   ;;  %v2422_v47 = vmov (!%p1907_p10), 0.0  }
  0x76   : > { %v2650_v24 = vsub.s32 0, %v2647_v23  ;;  %v2653_v25 = vsub.s32 2, %v2647_v23  ;;  %v2659_v27 = vsub.s32 1, %v2647_v23  ;;  %vm2423_vm6 = vmmov (!%p1907_p10), 0  }
  0x77   : > { %2036 = vmatpush3.bf16.msra.mxu1 %v2161_v18  ;;  %v2424_v49 = vmov (!%p1907_p10), 1966171168   ;;  %v473_v0 = vld [vmem:[#allocation3] ss:$2 sm:$0x7] (!%p1907_p10)  ;;  %vm2690_vm7 = vcmp.lt.s32.totalorder (!%p1907_p10), %v303_v6, 384 }
  0x78   : > { %389 = vmatpush1.bf16.msra.mxu0 %v2160_v17  ;;  %v338_v28 = vrot.slane %v311_v26, %v2650_v24  ;;  %v346_v29 = vrot.slane %v311_v26, %v2653_v25  ;;  %v342_v30 = vrot.slane %v311_v26, %v2659_v27  ;;  %2041 = vmatprep.subr.mxu1 (!%p1907_p10), %v2422_v47  ;;  %v624_v50 = vunpack.c.l.s4 (!%p1907_p10), %v2424_v49  ;;  %v653_v18 = vld [vmem:[#allocation3 + $0x1] ss:$2 sm:$0x7] (!%p1907_p10) }
  0x7a   : > { %v625_v51 = vunpack.c.0.s8 (!%p1907_p10), %v624_v50 }
  0x7c   : > { %v324_v21 = vld [vmem:[#allocation2] sm:$0xff]  ;;  %v628_v53 = vsub.s32 (!%p1907_p10), %v625_v51, %v2647_v23 }
  0x7d   : > { %v325_v22 = vpack.c.bf16 %v324_v21, %v324_v21 }
  0x7f   : > { %1905 = vmatmul.mubr.msk.bf16.vlgmr.msra.gmra.mrb[0].mxu0 %vm382_vm4, %v325_v22  ;;  %2038 = vmatmul.mubr.msk.bf16.vlgmr.msra.gmra.mrb[0].mxu1 %vm382_vm4, %v325_v22 }
  0x80   : > { %542 = vmatprep.mubr.f32.mxu0 (!%p1907_p10), %v2422_v47  ;;  %2043 = vmatprep.mubr.msk.f32.mxu1 (!%p1907_p10), %vm2423_vm6, %v2422_v47 }
 0x150   : > { %472 = sbr.rel (%p1907_p10) target bundleno = 607 (0x25f), region = 68 }
 0x152   : > { %v420_v31 = vpop.f32.mrb[0].mxu0  ;;  %v461_v32 = vpop.f32.mrb[0].mxu1 }
 0x153   : > { %v421_v33 = vadd.f32 %v420_v31, %v338_v28  ;;  %v462_v34 = vadd.f32 %v461_v32, %v346_v29  ;;  %v422_v35 = vpop.f32.mrb[1].mxu0  ;;  %v2039_v36 = vpop.f32.mrb[1].mxu1 }
 0x154   : > { %v423_v37 = vadd.f32 %v422_v35, %v342_v30  ;;  %v424_v38 = vpop.f32.mrb[2].mxu0  ;;  %v464_v39 = vpop.f32.mrb[2].mxu1 }
 0x155   : > { %v2664_v40 = vmax.f32 %v421_v33, 0.0  ;;  %v2666_v41 = vmax.f32 %v462_v34, 0.0  ;;  %v425_v42 = vpop.f32.mrb[3].mxu0  ;;  %v2040_v43 = vpop.f32.mrb[3].mxu1 }
 0x156   : > { %v2668_v44 = vmax.f32 %v423_v37, 0.0 }
 0x157   : > { %v654_v46 = vmul.f32 %v2664_v40, %v2664_v40  ;;  %v656_v48 = vmul.f32 %v2666_v41, %v2666_v41  ;;  %2042 = vmatpush3.msra.mxu1 %v2666_v41 }
 0x158   : > { %478 = vmatprep.subr.mxu0 %v2668_v44  ;;  %v655_v45 = vmul.f32 %v2668_v44, %v2668_v44  ;;  %2044 = vmatmul.mubr.msk.f32.vlgmr.msra.gmra.mrb[0].mxu1 %vm474_vm5, %v2635_v15 }
 0x159   : > { %479 = vmatpush1.msra.mxu0 %v2664_v40  ;;  %2046 = vmatprep.subr.mxu1 %v2422_v47 }
 0x15a   : > { %1908 = vmatmul.mubr.msk.f32.vlgmr.msra.gmra.mrb[0].mxu0 %vm474_vm5, %v2635_v15  ;;  %657 = vmatprep.subr.mxu0 %v655_v45 }
 0x15b   : > { %658 = vmatpush1.msra.mxu0 %v654_v46  ;;  %721 = vmatprep.mubr.f32.mxu0 %v2422_v47 }
 0x15c   : > { %2047 = vmatpush3.msra.mxu1 %v656_v48  ;;  %2048 = vmatprep.mubr.msk.f32.mxu1 %vm2423_vm6, %v2422_v47 }
 0x15d   : > { %2049 = vmatmul.mubr.msk.f32.vlgmr.msra.gmra.mrb[2].mxu1 %vm474_vm5, %v2635_v15 }
 0x15e   : > { %1910 = vmatmul.mubr.msk.f32.vlgmr.msra.gmra.mrb[2].mxu0 %vm474_vm5, %v2635_v15 }
 0x22b   : > { %v615_v56 = vpop.f32.mrb[0].mxu1 }
 0x22c   : > { %v636_v58 = vrot.slane %v615_v56, %v628_v53  ;;  %v2045_v59 = vpop.f32.mrb[1].mxu1 }
 0x22d   : > { %v544_v52 = vpop.f32.mrb[0].mxu0 }
 0x22e   : > { %v546_v54 = vpop.f32.mrb[1].mxu0 }
 0x22f   : > { %v622_v55 = vcombine.low %v544_v52, %v546_v54 }
 0x230   : > { %v794_v1 = vpop.f32.mrb[2].mxu1 }
 0x231   : > { %v629_v57 = vrot.slane %v622_v55, %v628_v53  ;;  %v723_v60 = vpop.f32.mrb[2].mxu0  ;;  %v815_v12 = vrot.slane %v794_v1, %v628_v53  ;;  %v2050_v13 = vpop.f32.mrb[3].mxu1 }
 0x232   : > { %v725_v61 = vpop.f32.mrb[3].mxu0 }
 0x233   : > { %v637_v62 = vcombine.low %v629_v57, %v636_v58  ;;  %v801_v63 = vcombine.low %v723_v60, %v725_v61 }
 0x235   : > { %v644_v10 = vrot.slane %v637_v62, %v628_v53  ;;  %v808_v11 = vrot.slane %v801_v63, %v628_v53 }
 0x237   : > { %v646_v16 = vadd.f32 %v644_v10, %v473_v0  ;;  %v816_v17 = vcombine.low %v808_v11, %v815_v12 }
 0x239   : > { %651 = vst.msk [vmem:[#allocation3] ss:$2 sm:$0x7] %vm2690_vm7, %v646_v16  ;;  %v823_v19 = vrot.slane %v816_v17, %v628_v53 }
 0x23b   : > { %v825_v20 = vadd.f32 %v823_v19, %v653_v18 }
 0x23d   : > { %826 = vst.msk [vmem:[#allocation3 + $0x1] ss:$2 sm:$0x7] %vm2690_vm7, %v825_v20 }
 0x240   : > { %v830_v21 = vld [vmem:[#allocation3] ss:$2 sm:$0x7] }
 0x241   : > { %v831_v22 = vmul.f32 0.125, %v830_v21 }
 0x243   : > { %v834_v29 = vmul.f32 %v831_v22, %v831_v22 }
 0x244   : > { %v832_v26 = vld [vmem:[#allocation3 + $0x1] ss:$2 sm:$0x7] }
 0x245   : > { %v833_v28 = vmul.f32 0.125, %v832_v26 }
 0x247   : > { %v835_v30 = vsub.f32 %v833_v28, %v834_v29 }
 0x249   : > { %v836_v31 = vmax.f32 %v835_v30, 0.0 }
 0x24b   : > { %v837_v32 = vadd.f32 1e-05, %v836_v31 }
 0x24d   : > { %2162 = vrsqrt.f32 %v837_v32 }
 0x257   : > { %v2163_v33 = vpop.eup %2162 }
 0x258   : > { %v839_v34 = vmul.f32 %v2163_v33, %v2593_v2 }
 0x25a   : > { %840 = vst.msk [vmem:[#allocation3] ss:$2 sm:$0x7] %vm2690_vm7, %v839_v34  ;;  %v841_v35 = vmul.f32 %v839_v34, %v831_v22 }
 0x25c   : > { %v842_v36 = vsub.f32 %v2598_v3, %v841_v35 }
 0x25e   : > { %843 = vst.msk [vmem:[#allocation3 + $0x1] ss:$2 sm:$0x7] %vm2690_vm7, %v842_v36 }
 0x25f PF: > { %p1912_p11 = scmp.le.s32.totalorder %s2400_s21, 0 }
 0x260   : > { %v2164_v37 = vld [vmem:[#allocation8 + $0x4] ss:$8 sps:$4 sm:$0xff] (!%p1912_p11)   ;;  %v2166_v38 = vld [vmem:[#allocation8] ss:$8 sps:$4 sm:$0xff] (!%p1912_p11)   ;;  %v2425_v39 = vmov (!%p1912_p11), 0   ;;  %p1961_p12 = scmp.ne.s32.totalorder (!%p1912_p11), %s2400_s21, 1 }
 0x261   : > { %847 = sbr.rel (%p1912_p11) target bundleno = 1632 (0x660), region = 76  ;;  %1264 = vmatprep.mubr.bf16.mxu0 (!%p1912_p11), %v2425_v39  ;;  %1191 = vmatprep.subr.bf16.mxu1 (!%p1912_p11), %v2164_v37  ;;  %v2167_v42 = vld [vmem:[#allocation8 + $0x14] ss:$8 sps:$4 sm:$0xff] (!%p1912_p11)   ;;  %v2169_v2 = vld [vmem:[#allocation8 + $0x10] ss:$8 sps:$4 sm:$0xff] (!%p1912_p11)  }
 0x262   : > { %1192 = vmatpush1.bf16.msra.mxu1 (!%p1912_p11), %v2166_v38  ;;  %v2170_v43 = vld [vmem:[#allocation8 + $0x24] ss:$8 sps:$4 sm:$0xff] (!%p1912_p11)   ;;  %v2172_v45 = vld [vmem:[#allocation8 + $0x20] ss:$8 sps:$4 sm:$0xff] (!%p1912_p11)   ;;  %v2173_v3 = vld [vmem:[#allocation8 + $0x34] ss:$8 sps:$4 sm:$0xff] (!%p1912_p11)  }
 0x263   : > { %1193 = vmatprep.subr.bf16.mxu1 (!%p1912_p11), %v2167_v42  ;;  %v2175_v46 = vld [vmem:[#allocation8 + $0x30] ss:$8 sps:$4 sm:$0xff] (!%p1912_p11)   ;;  %v2188_v47 = vld [vmem:[#allocation8 + $0x104] ss:$8 sps:$4 sm:$0xff] (!%p1912_p11)   ;;  %v2192_v49 = vld [vmem:[#allocation8 + $0x100] ss:$8 sps:$4 sm:$0xff] (!%p1912_p11)  }
 0x264   : > { %v2176_v48 = vld [vmem:[#allocation8 + $0x44] ss:$8 sps:$4 sm:$0xff] (!%p1912_p11)   ;;  %1232 = vmatprep.subr.bf16.mxu0 (!%p1912_p11), %v2188_v47  ;;  %v2194_v50 = vld [vmem:[#allocation8 + $0x114] ss:$8 sps:$4 sm:$0xff] (!%p1912_p11)   ;;  %v2178_v51 = vld [vmem:[#allocation8 + $0x40] ss:$8 sps:$4 sm:$0xff] (!%p1912_p11)  }
 0x265   : > { %1233 = vmatpush1.bf16.msra.mxu0 (!%p1912_p11), %v2192_v49  ;;  %v2179_v52 = vld [vmem:[#allocation8 + $0x54] ss:$8 sps:$4 sm:$0xff] (!%p1912_p11)   ;;  %v2198_v53 = vld [vmem:[#allocation8 + $0x110] ss:$8 sps:$4 sm:$0xff] (!%p1912_p11)   ;;  %v2200_v54 = vld [vmem:[#allocation8 + $0x124] ss:$8 sps:$4 sm:$0xff] (!%p1912_p11)  }
 0x266   : > { %1194 = vmatpush1.bf16.msra.mxu1 (!%p1912_p11), %v2169_v2  ;;  %1234 = vmatprep.subr.bf16.mxu0 (!%p1912_p11), %v2194_v50  ;;  %v2181_v55 = vld [vmem:[#allocation8 + $0x50] ss:$8 sps:$4 sm:$0xff] (!%p1912_p11)   ;;  %v2204_v56 = vld [vmem:[#allocation8 + $0x120] ss:$8 sps:$4 sm:$0xff] (!%p1912_p11)   ;;  %v2206_v57 = vld [vmem:[#allocation8 + $0x134] ss:$8 sps:$4 sm:$0xff] (!%p1912_p11)  }
 0x267   : > { %1195 = vmatprep.subr.bf16.mxu1 (!%p1912_p11), %v2170_v43  ;;  %v2182_v58 = vld [vmem:[#allocation8 + $0x64] ss:$8 sps:$4 sm:$0xff] (!%p1912_p11)   ;;  %v2210_v59 = vld [vmem:[#allocation8 + $0x130] ss:$8 sps:$4 sm:$0xff] (!%p1912_p11)   ;;  %v2184_v60 = vld [vmem:[#allocation8 + $0x60] ss:$8 sps:$4 sm:$0xff] (!%p1912_p11)  }
 0x268   : > { %v2212_v61 = vld [vmem:[#allocation8 + $0x144] ss:$8 sps:$4 sm:$0xff]   ;;  %v2185_v62 = vld [vmem:[#allocation8 + $0x74] ss:$8 sps:$4 sm:$0xff]   ;;  %v2187_v63 = vld [vmem:[#allocation8 + $0x70] ss:$8 sps:$4 sm:$0xff]  }
 0x269   : > { %1235 = vmatpush1.bf16.msra.mxu0 %v2198_v53  ;;  %v2216_v0 = vld [vmem:[#allocation8 + $0x140] ss:$8 sps:$4 sm:$0xff]   ;;  %v2218_v1 = vld [vmem:[#allocation8 + $0x154] ss:$8 sps:$4 sm:$0xff]   ;;  %v2190_v10 = vld [vmem:[#allocation8 + $0x84] ss:$8 sps:$4 sm:$0xff]  }
 0x26a   : > { %1196 = vmatpush1.bf16.msra.mxu1 %v2172_v45  ;;  %1236 = vmatprep.subr.bf16.mxu0 %v2200_v54  ;;  %v2222_v11 = vld [vmem:[#allocation8 + $0x150] ss:$8 sps:$4 sm:$0xff]   ;;  %v2193_v12 = vld [vmem:[#allocation8 + $0x80] ss:$8 sps:$4 sm:$0xff]   ;;  %v2196_v13 = vld [vmem:[#allocation8 + $0x94] ss:$8 sps:$4 sm:$0xff]  }
 0x26b   : > { %1197 = vmatprep.subr.bf16.mxu1 %v2173_v3  ;;  %v2224_v14 = vld [vmem:[#allocation8 + $0x164] ss:$8 sps:$4 sm:$0xff]   ;;  %v2228_v22 = vld [vmem:[#allocation8 + $0x160] ss:$8 sps:$4 sm:$0xff]   ;;  %v2199_v26 = vld [vmem:[#allocation8 + $0x90] ss:$8 sps:$4 sm:$0xff]  }
 0x26c   : > { %v848_v16 = vld [vmem:[#allocation3] ss:$2 sm:$0x7]  ;;  %v869_v17 = vld [vmem:[#allocation3 + $0x1] ss:$2 sm:$0x7] }
 0x26d   : > { %1237 = vmatpush1.bf16.msra.mxu0 %v2204_v56  ;;  %v857_v18 = vrot.slane %v848_v16, %v2659_v27  ;;  %v878_v19 = vrot.slane %v869_v17, %v2659_v27  ;;  %v861_v20 = vrot.slane %v848_v16, %v2653_v25  ;;  %v882_v21 = vrot.slane %v869_v17, %v2653_v25  ;;  %v2230_v28 = vld [vmem:[#allocation8 + $0x174] ss:$8 sps:$4 sm:$0xff]   ;;  %v2202_v31 = vld [vmem:[#allocation8 + $0xa4] ss:$8 sps:$4 sm:$0xff]   ;;  %v2234_v34 = vld [vmem:[#allocation8 + $0x170] ss:$8 sps:$4 sm:$0xff]  }
 0x26e   : > { %1198 = vmatpush1.bf16.msra.mxu1 %v2175_v46  ;;  %1238 = vmatprep.subr.bf16.mxu0 %v2206_v57  ;;  %v2205_v35 = vld [vmem:[#allocation8 + $0xa0] ss:$8 sps:$4 sm:$0xff]   ;;  %v2208_v36 = vld [vmem:[#allocation8 + $0xb4] ss:$8 sps:$4 sm:$0xff]   ;;  %v2211_v38 = vld [vmem:[#allocation8 + $0xb0] ss:$8 sps:$4 sm:$0xff]   ;;  %v853_v42 = vrot.slane %v848_v16, %v2650_v24  ;;  %v874_v3 = vrot.slane %v869_v17, %v2650_v24 }
 0x26f   : > { %1199 = vmatprep.subr.bf16.mxu1 %v2176_v48  ;;  %v866_v29 = vmul.f32 %v857_v18, %v2668_v44  ;;  %v867_v30 = vmul.f32 %v861_v20, %v2666_v41  ;;  %v2214_v44 = vld [vmem:[#allocation8 + $0xc4] ss:$8 sps:$4 sm:$0xff]   ;;  %v2217_v41 = vld [vmem:[#allocation8 + $0xc0] ss:$8 sps:$4 sm:$0xff]   ;;  %v2220_v39 = vld [vmem:[#allocation8 + $0xd4] ss:$8 sps:$4 sm:$0xff]  }
 0x270   : > { %v2223_v2 = vld [vmem:[#allocation8 + $0xd0] ss:$8 sps:$4 sm:$0xff]   ;;  %v2226_v43 = vld [vmem:[#allocation8 + $0xe4] ss:$8 sps:$4 sm:$0xff]   ;;  %v865_v45 = vmul.f32 %v853_v42, %v2664_v40  ;;  %v2229_v46 = vld [vmem:[#allocation8 + $0xe0] ss:$8 sps:$4 sm:$0xff]   ;;  %v944_v40 = vrot.slane %v2603_v4, %v2650_v24 }
 0x271   : > { %1239 = vmatpush1.bf16.msra.mxu0 %v2210_v59  ;;  %v887_v32 = vadd.f32 %v878_v19, %v866_v29  ;;  %v888_v33 = vadd.f32 %v882_v21, %v867_v30  ;;  %v2232_v47 = vld [vmem:[#allocation8 + $0xf4] ss:$8 sps:$4 sm:$0xff]   ;;  %v2235_v49 = vld [vmem:[#allocation8 + $0xf0] ss:$8 sps:$4 sm:$0xff]   ;;  %vm1279_vm8 = vcmask (!%p1961_p12), 64512   ;;  %vm2733_vm9 = vcmp.lt.s32.totalorder (!%p1961_p12), %v303_v6, 256 }
 0x272   : > { %1200 = vmatpush1.bf16.msra.mxu1 %v2178_v51  ;;  %1240 = vmatprep.subr.bf16.mxu0 %v2212_v61  ;;  %v886_v48 = vadd.f32 %v874_v3, %v865_v45 }
 0x273   : > { %1201 = vmatprep.subr.bf16.mxu1 %v2179_v52  ;;  %v890_v25 = vpack.c.bf16 %v887_v32, %v887_v32  ;;  %v891_v37 = vpack.c.bf16 %v888_v33, %v888_v33 }
 0x274   : > { %v889_v50 = vpack.c.bf16 %v886_v48, %v886_v48 }
 0x275   : > { %1241 = vmatpush1.bf16.msra.mxu0 %v2216_v0  ;;  %1223 = vmatprep.mubr.bf16.mxu1 %v890_v25 }
 0x276   : > { %1202 = vmatpush1.bf16.msra.mxu1 %v2181_v55  ;;  %1242 = vmatprep.subr.bf16.mxu0 %v2218_v1  ;;  %v948_v55 = vrot.slane %v2603_v4, %v2659_v27 }
 0x277   : > { %1203 = vmatprep.subr.bf16.mxu1 %v2182_v58 }
 0x279   : > { %1243 = vmatpush1.bf16.msra.mxu0 %v2222_v11  ;;  %v2426_v11 = vmov (!%p1961_p12), 0.0  }
 0x27a   : > { %1204 = vmatpush1.bf16.msra.mxu1 %v2184_v60  ;;  %1244 = vmatprep.subr.bf16.mxu0 %v2224_v14 }
 0x27b   : > { %1205 = vmatprep.subr.bf16.mxu1 %v2185_v62 }
 0x27d   : > { %1245 = vmatpush1.bf16.msra.mxu0 %v2228_v22 }
 0x27e   : > { %1206 = vmatpush1.bf16.msra.mxu1 %v2187_v63  ;;  %1246 = vmatprep.subr.bf16.mxu0 %v2230_v28  ;;  %v1278_v28 = vld [vmem:[#allocation4] ss:$2 sm:$0x3] (!%p1961_p12) }
 0x27f   : > { %1207 = vmatprep.subr.bf16.mxu1 %v2190_v10 }
 0x281   : > { %1247 = vmatpush1.bf16.msra.mxu0 %v2234_v34 }
 0x282   : > { %1208 = vmatpush1.bf16.msra.mxu1 %v2193_v12  ;;  %v2427_v12 = vmov (!%p1961_p12), 1966171168  }
 0x283   : > { %1209 = vmatprep.subr.bf16.mxu1 %v2196_v13  ;;  %v1358_v13 = vunpack.c.l.s4 (!%p1961_p12), %v2427_v12 }
 0x284   : > { %1265 = vmatmul.mubr.bf16.vlgmr.msra.gmra.mrb[0].mxu0 %v891_v37 }
 0x285   : > { %1347 = vmatprep.mubr.f32.mxu0 (!%p1961_p12), %v2426_v11  ;;  %v1359_v14 = vunpack.c.0.s8 (!%p1961_p12), %v1358_v13 }
 0x286   : > { %1210 = vmatpush1.bf16.msra.mxu1 %v2199_v26 }
 0x287   : > { %1211 = vmatprep.subr.bf16.mxu1 %v2202_v31  ;;  %v1362_v17 = vsub.s32 (!%p1961_p12), %v1359_v14, %v2647_v23 }
 0x28a   : > { %1212 = vmatpush1.bf16.msra.mxu1 %v2205_v35 }
 0x28b   : > { %1213 = vmatprep.subr.bf16.mxu1 %v2208_v36 }
 0x28e   : > { %1214 = vmatpush1.bf16.msra.mxu1 %v2211_v38 }
 0x28f   : > { %1215 = vmatprep.subr.bf16.mxu1 %v2214_v44 }
 0x292   : > { %1216 = vmatpush1.bf16.msra.mxu1 %v2217_v41 }
 0x293   : > { %1217 = vmatprep.subr.bf16.mxu1 %v2220_v39 }
 0x296   : > { %1218 = vmatpush1.bf16.msra.mxu1 %v2223_v2 }
 0x297   : > { %1219 = vmatprep.subr.bf16.mxu1 %v2226_v43 }
 0x29a   : > { %1220 = vmatpush1.bf16.msra.mxu1 %v2229_v46 }
 0x29b   : > { %1221 = vmatprep.subr.bf16.mxu1 %v2232_v47 }
 0x29e   : > { %1222 = vmatpush1.bf16.msra.mxu1 %v2235_v49 }
 0x2a1   : > { %1224 = vmatmul.mubr.bf16.vlgmr.msra.gmra.mrb[0].mxu1 %v889_v50 }
 0x2a2   : > { %1446 = vmatprep.mubr.f32.mxu1 (!%p1961_p12), %v2426_v11 }
 0x357   : > { %v1266_v51 = vpop.f32.mrb[0].mxu0 }
 0x358   : > { %v1268_v52 = vpop.f32.mrb[1].mxu0 }
 0x359   : > { %v1270_v53 = vpop.f32.mrb[2].mxu0 }
 0x35a   : > { %v1271_v54 = vpop.f32.mrb[3].mxu0 }
 0x374   : > { %v1225_v56 = vpop.f32.mrb[0].mxu1  ;;  %1277 = sbr.rel (%p1961_p12) target bundleno = 1151 (0x47f), region = 80 }
 0x375   : > { %v1226_v57 = vadd.f32 %v1225_v56, %v944_v40  ;;  %v1227_v58 = vpop.f32.mrb[1].mxu1 }
 0x376   : > { %v1228_v59 = vadd.f32 %v1227_v58, %v948_v55  ;;  %v1229_v60 = vpop.f32.mrb[2].mxu1 }
 0x377   : > { %v1267_v61 = vadd.f32 %v1266_v51, %v1226_v57  ;;  %v1230_v62 = vpop.f32.mrb[3].mxu1 }
 0x378   : > { %v1269_v63 = vadd.f32 %v1268_v52, %v1228_v59 }
 0x379   : > { %v2718_v0 = vmax.f32 %v1267_v61, 0.0 }
 0x37a   : > { %v2720_v1 = vmax.f32 %v1269_v63, 0.0 }
 0x37b   : > { %v1380_v10 = vmul.f32 %v2718_v0, %v2718_v0 }
 0x37c   : > { %1283 = vmatprep.subr.mxu0 %v2720_v1  ;;  %v1381_v4 = vmul.f32 %v2720_v1, %v2720_v1 }
 0x37d   : > { %1284 = vmatpush1.msra.mxu0 %v2718_v0 }
 0x37e   : > { %1962 = vmatmul.mubr.msk.f32.vlgmr.msra.gmra.mrb[0].mxu0 %vm1279_vm8, %v2635_v15  ;;  %1382 = vmatprep.subr.mxu1 %v1381_v4 }
 0x37f   : > { %1383 = vmatpush1.msra.mxu1 %v1380_v10 }
 0x380   : > { %1963 = vmatmul.mubr.msk.f32.vlgmr.msra.gmra.mrb[0].mxu1 %vm1279_vm8, %v2635_v15  ;;  %v1379_v15 = vld [vmem:[#allocation4 + $0x1] ss:$2 sm:$0x3] }
 0x451   : > { %v1349_v16 = vpop.f32.mrb[0].mxu0 }
 0x452   : > { %v1351_v18 = vpop.f32.mrb[1].mxu0 }
 0x453   : > { %v1356_v19 = vcombine.low %v1349_v16, %v1351_v18  ;;  %v1448_v20 = vpop.f32.mrb[0].mxu1 }
 0x454   : > { %v1450_v21 = vpop.f32.mrb[1].mxu1 }
 0x455   : > { %v1363_v22 = vrot.slane %v1356_v19, %v1362_v17  ;;  %v1455_v26 = vcombine.low %v1448_v20, %v1450_v21 }
 0x457   : > { %v1370_v29 = vrot.slane %v1363_v22, %v1362_v17  ;;  %v1462_v30 = vrot.slane %v1455_v26, %v1362_v17 }
 0x459   : > { %v1372_v32 = vadd.f32 %v1370_v29, %v1278_v28  ;;  %v1469_v33 = vrot.slane %v1462_v30, %v1362_v17 }
 0x45b   : > { %1377 = vst.msk [vmem:[#allocation4] ss:$2 sm:$0x3] %vm2733_vm9, %v1372_v32  ;;  %v1471_v23 = vadd.f32 %v1469_v33, %v1379_v15 }
 0x45d   : > { %1472 = vst.msk [vmem:[#allocation4 + $0x1] ss:$2 sm:$0x3] %vm2733_vm9, %v1471_v23 }
 0x462   : > { %v1476_v34 = vld [vmem:[#allocation4] ss:$2 sm:$0x3] }
 0x463   : > { %v1477_v35 = vmul.f32 0.125, %v1476_v34 }
 0x464   : > { %v1478_v25 = vld [vmem:[#allocation4 + $0x1] ss:$2 sm:$0x3] }
 0x465   : > { %v1479_v36 = vmul.f32 0.125, %v1478_v25  ;;  %v1480_v37 = vmul.f32 %v1477_v35, %v1477_v35 }
 0x467   : > { %v1481_v38 = vsub.f32 %v1479_v36, %v1480_v37 }
 0x469   : > { %v1482_v6 = vmax.f32 %v1481_v38, 0.0 }
 0x46b   : > { %v1483_v44 = vadd.f32 1e-05, %v1482_v6 }
 0x46d   : > { %2236 = vrsqrt.f32 %v1483_v44 }
 0x477   : > { %v2237_v41 = vpop.eup %2236 }
 0x478   : > { %v1485_v39 = vmul.f32 %v2237_v41, %v2608_v5 }
 0x47a   : > { %1486 = vst.msk [vmem:[#allocation4] ss:$2 sm:$0x3] %vm2733_vm9, %v1485_v39  ;;  %v1487_v42 = vmul.f32 %v1485_v39, %v1477_v35 }
 0x47c   : > { %v1488_v2 = vsub.f32 %v2613_v7, %v1487_v42 }
 0x47e   : > { %1489 = vst.msk [vmem:[#allocation4 + $0x1] ss:$2 sm:$0x3] %vm2733_vm9, %v1488_v2 }
 0x47f PF: > { %p1964_p13 = scmp.ne.s32.totalorder %s2400_s21, 2 }
 0x480   : > { %v2238_v43 = vld [vmem:[#allocation10 + $0x40] sm:$0xff] (!%p1964_p13)   ;;  %v2428_v3 = vmov (!%p1964_p13), 0.0   ;;  %v2240_v5 = vld [vmem:[#allocation10 + $0x48] sm:$0xff] (!%p1964_p13)   ;;  %v2242_v47 = vld [vmem:[#allocation10 + $0x50] sm:$0xff] (!%p1964_p13)   ;;  %vm2429_vm10 = vmmov (!%p1964_p13), 0   ;;  %vm1800_vm11 = vcmask (!%p1964_p13), 64512  }
 0x481   : > { %1493 = sbr.rel (%p1964_p13) target bundleno = 1632 (0x660), region = 88  ;;  %v2239_v45 = vld [vmem:[#allocation10] sm:$0xff] (!%p1964_p13)   ;;  %2051 = vmatprep.subr.bf16.mxu1 (!%p1964_p13), %v2428_v3  ;;  %2002 = vmatprep.subr.bf16.mxu0 (!%p1964_p13), %v2238_v43  ;;  %v2241_v46 = vld [vmem:[#allocation10 + $0x8] sm:$0xff] (!%p1964_p13)   ;;  %v2243_v7 = vld [vmem:[#allocation10 + $0x10] sm:$0xff] (!%p1964_p13)  }
 0x482   : > { %2003 = vmatpush3.bf16.msra.mxu0 (!%p1964_p13), %v2239_v45  ;;  %v2244_v48 = vld [vmem:[#allocation10 + $0x58] sm:$0xff] (!%p1964_p13)   ;;  %v2246_v50 = vld [vmem:[#allocation10 + $0x60] sm:$0xff] (!%p1964_p13)   ;;  %v2248_v52 = vld [vmem:[#allocation10 + $0x68] sm:$0xff] (!%p1964_p13)   ;;  %2067 = vmatprep.mubr.msk.bf16.mxu1 (!%p1964_p13), %vm2429_vm10, %v2428_v3 }
 0x483   : > { %2004 = vmatprep.subr.bf16.mxu0 (!%p1964_p13), %v2240_v5  ;;  %v2245_v49 = vld [vmem:[#allocation10 + $0x18] sm:$0xff] (!%p1964_p13)   ;;  %v2247_v51 = vld [vmem:[#allocation10 + $0x20] sm:$0xff] (!%p1964_p13)   ;;  %v1494_v53 = vld [vmem:[#allocation4] ss:$2 sm:$0x3] (!%p1964_p13) }
 0x484   : > { %v1503_v40 = vrot.slane (!%p1964_p13), %v1494_v53, %v2659_v27  ;;  %v2254_v56 = vld [vmem:[%s2830_s4] sm:$0xff] (!%p1964_p13)   ;;  %v1499_v58 = vrot.slane (!%p1964_p13), %v1494_v53, %v2650_v24  ;;  %v2255_v60 = vld [vmem:[%s2830_s4 + $0x8] sm:$0xff] (!%p1964_p13)   ;;  %v2256_v10 = vld [vmem:[%s2830_s4 + $0x10] sm:$0xff] (!%p1964_p13)  }
 0x485   : > { %v1509_v54 = vld [vmem:[#allocation4 + $0x1] ss:$2 sm:$0x3] (!%p1964_p13)  ;;  %v2249_v57 = vld [vmem:[#allocation10 + $0x28] sm:$0xff] (!%p1964_p13)   ;;  %2052 = vmatpush3.bf16.msra.mxu1 (!%p1964_p13), %v2254_v56  ;;  %v2252_v11 = vld [vmem:[#allocation10 + $0x78] sm:$0xff] (!%p1964_p13)  }
 0x486   : > { %2005 = vmatpush3.bf16.msra.mxu0 (!%p1964_p13), %v2241_v46  ;;  %v1518_v55 = vrot.slane (!%p1964_p13), %v1509_v54, %v2659_v27  ;;  %v1507_v59 = vmul.f32 (!%p1964_p13), %v1503_v40, %v2720_v1  ;;  %v2250_v61 = vld [vmem:[#allocation10 + $0x70] sm:$0xff] (!%p1964_p13)   ;;  %2053 = vmatprep.subr.bf16.mxu1 (!%p1964_p13), %v2428_v3  ;;  %v1506_v63 = vmul.f32 (!%p1964_p13), %v1499_v58, %v2718_v0  ;;  %v2253_v13 = vld [vmem:[#allocation10 + $0x38] sm:$0xff] (!%p1964_p13)   ;;  %v2258_v14 = vld [vmem:[%s2830_s4 + $0x20] sm:$0xff] (!%p1964_p13)  }
 0x487   : > { %2006 = vmatprep.subr.bf16.mxu0 (!%p1964_p13), %v2242_v47  ;;  %v2251_v27 = vld [vmem:[#allocation10 + $0x30] sm:$0xff] (!%p1964_p13)   ;;  %v1514_v4 = vrot.slane (!%p1964_p13), %v1509_v54, %v2650_v24  ;;  %v2257_v24 = vld [vmem:[%s2830_s4 + $0x18] sm:$0xff] (!%p1964_p13)  }
 0x488   : > { %v1522_v62 = vadd.f32 %v1518_v55, %v1507_v59  ;;  %v2259_v16 = vld [vmem:[%s2830_s4 + $0x28] sm:$0xff]   ;;  %v2260_v17 = vld [vmem:[%s2830_s4 + $0x30] sm:$0xff]   ;;  %v2261_v18 = vld [vmem:[%s2830_s4 + $0x38] sm:$0xff]  }
 0x489   : > { %2054 = vmatpush3.bf16.msra.mxu1 %v2255_v60  ;;  %v1521_v12 = vadd.f32 %v1514_v4, %v1506_v63 }
 0x48a   : > { %2007 = vmatpush3.bf16.msra.mxu0 %v2243_v7  ;;  %v1524_v1 = vpack.c.bf16 %v1522_v62, %v1522_v62  ;;  %2055 = vmatprep.subr.bf16.mxu1 %v2428_v3 }
 0x48b   : > { %2008 = vmatprep.subr.bf16.mxu0 %v2244_v48  ;;  %v1523_v0 = vpack.c.bf16 %v1521_v12, %v1521_v12 }
 0x48c   : > { %1685 = vmatprep.mubr.bf16.mxu0 %v1524_v1 }
 0x48d   : > { %2056 = vmatpush3.bf16.msra.mxu1 %v2256_v10 }
 0x48e   : > { %2009 = vmatpush3.bf16.msra.mxu0 %v2245_v49  ;;  %2057 = vmatprep.subr.bf16.mxu1 %v2428_v3 }
 0x48f   : > { %2010 = vmatprep.subr.bf16.mxu0 %v2246_v50 }
 0x491   : > { %2058 = vmatpush3.bf16.msra.mxu1 %v2257_v24 }
 0x492   : > { %2011 = vmatpush3.bf16.msra.mxu0 %v2247_v51  ;;  %2059 = vmatprep.subr.bf16.mxu1 %v2428_v3 }
 0x493   : > { %2012 = vmatprep.subr.bf16.mxu0 %v2248_v52 }
 0x495   : > { %2060 = vmatpush3.bf16.msra.mxu1 %v2258_v14 }
 0x496   : > { %2013 = vmatpush3.bf16.msra.mxu0 %v2249_v57  ;;  %2061 = vmatprep.subr.bf16.mxu1 %v2428_v3 }
 0x497   : > { %2014 = vmatprep.subr.bf16.mxu0 %v2250_v61 }
 0x499   : > { %2062 = vmatpush3.bf16.msra.mxu1 %v2259_v16 }
 0x49a   : > { %2015 = vmatpush3.bf16.msra.mxu0 %v2251_v27  ;;  %2063 = vmatprep.subr.bf16.mxu1 %v2428_v3 }
 0x49b   : > { %2016 = vmatprep.subr.bf16.mxu0 %v2252_v11 }
 0x49d   : > { %2064 = vmatpush3.bf16.msra.mxu1 %v2260_v17 }
 0x49e   : > { %2017 = vmatpush3.bf16.msra.mxu0 %v2253_v13  ;;  %2065 = vmatprep.subr.bf16.mxu1 %v2428_v3 }
 0x4a1   : > { %1686 = vmatmul.mubr.bf16.vlgmr.msra.gmra.mrb[0].mxu0 %v1523_v0  ;;  %2066 = vmatpush3.bf16.msra.mxu1 %v2261_v18 }
 0x574   : > { %v2018_v19 = vpop.f32.mrb[0].mxu0 }
 0x575   : > { %v2019_v20 = vpop.f32.mrb[1].mxu0 }
 0x576   : > { %v2020_v21 = vadd.f32 %v2019_v20, %v2018_v19  ;;  %v2021_v22 = vpop.f32.mrb[2].mxu0 }
 0x577   : > { %v2022_v26 = vpop.f32.mrb[3].mxu0 }
 0x578   : > { %v1688_v28 = vadd.f32 %v2020_v21, %v2618_v8 }
 0x57a   : > { %v1693_v29 = vmax.f32 %v1688_v28, 0.0 }
 0x57c   : > { %v1694_v30 = vpack.c.bf16 %v1693_v29, %v1693_v29 }
 0x57e   : > { %2068 = vmatmul.mubr.bf16.vlgmr.msra.gmra.mrb[0].mxu1 %v1694_v30 }
 0x651   : > { %v1793_v31 = vpop.f32.mrb[0].mxu1 }
 0x652   : > { %v1794_v15 = vadd.f32 %v1793_v31, %v2623_v9  ;;  %v2069_v32 = vpop.f32.mrb[1].mxu1 }
 0x653   : > { %v1796_v33 = vpop.f32.mrb[2].mxu1 }
 0x654   : > { %2262 = vtanh.f32 %v1794_v15  ;;  %v2070_v23 = vpop.f32.mrb[3].mxu1 }
 0x65e   : > { %v2263_v34 = vpop.eup %2262 }
 0x65f   : > { %1801 = vst.msk [vmem:[#allocation11] sm:$0xff] %vm1800_vm11, %v2263_v34 }
 0x660 PF: > { %p2791_p6 = scmp.eq.s32.totalorder %s1882_s26, 2  ;;  %s2430_s20 = smov [#allocation11]  }
 0x661   : > { %s1811_s24 = sshll.u32 %s2430_s20, 4  ;;  %s1812_s24 = int_to_ptr.vmem [resolvable:$true] %s1811_s24 }
 0x662   : > { %s2348_s8 = scalar_lea.vmem %s1812_s24, 128  ;;  %p2355_p7 = scmp.lt.s32.totalorder %s1812_s24, %s1812_s24 }
 0x663   : > { %p2349_p0 = scmp.ne.s32.totalorder %s1812_s24, %s2348_s8  ;;  %p2356_p9 = scmp.lt.s32.totalorder %s2348_s8, %s2348_s8 }
 0x665   : > { %p2350_p1 = pnand %p2349_p0, %p2791_p6  ;;  %p2357_p2 = por %p2356_p9, %p2355_p7 }
 0x667   : > { %p2351_p4 = pneg %p2350_p1 }
 0x669   : > { %p2358_p3 = pnand %p2357_p2, %p2351_p4 }
 0x66b   : > { %2361 = shalt.err (!%p2358_p3)
}
 0x66c   : > { %s2362_s26 = scalar_lea.hbm %s2832_s6, 128 }
 0x66d   : > { %p2363_p8 = scmp.ne.s32.totalorder %s2832_s6, %s2362_s26  ;;  %p2368_p11 = scmp.lt.u32.totalorder %s2362_s26, %s2832_s6 }
 0x66f   : > { %p2364_p5 = pnand %p2363_p8, %p2791_p6 }
 0x671   : > { %p2365_p10 = pneg %p2364_p5 }
 0x673   : > { %p2370_p12 = pnand %p2368_p11, %p2365_p10 }
 0x675   : > { %2373 = shalt.err (!%p2370_p12)
}
 0x676   : > { %2088 = dma.vmem_to_hbm [thread:$0]  (%p2791_p6), %s1812_s24, 128, %s2832_s6, [#allocation7]  }
 0x677   : > { %2395 = dma.done.wait (%p2791_p6), [#allocation7], 128  }
 0x678   : > { %2397 = vsyncadd (%p2791_p6), [#allocation7], 4294967168 }
 0x679 PF: > { %s19_s23 = sadd.s32 1, %s2408_s23   ;;  %s2848_s21 = smov %s2404_s22 }
 0x67a   : > { %p16_p13 = scmp.ge.s32.totalorder %s19_s23, 5   ;;  %s2849_s22 = smov %s2851_s30 }
 0x67c   :  { %18 = sbr.rel (!%p16_p13) target bundleno = 4 (0x4), region = 124 }
 0x683   :  { %1824 = vsyncpa [#allocation6], 1 }
 0x684   :  { %1826 = vsyncpa [#allocation6 + $0x1], 1 }
 0x685   :  { %1827 = vsyncpa [#allocation9], 1 }
 0x686   :  { %1828 = vsyncpa [#allocation7], 1 }
 0x687   :  { %1830 = vsyncpa [#allocation7 + $0x1], 1 }

</bundles_post_ra>
